<compile_context>
chip_gen: v5e
topology: v5e:2x2
jax: 0.10.0
libtpu: 0.0.40
codegen_flags: <defaults>
</compile_context>

<pallas_src>
import functools

import jax
import jax.numpy as jnp
from jax import lax
from jax.experimental import pallas as pl
from jax.experimental.pallas import tpu as pltpu


def _round_up(n, m):
    return ((n + m - 1) // m) * m


def toy_model_kernel(x_ref, w1_ref, b1_ref, w2_ref, b2_ref, o_ref, *,
                     chunk, compute_dtype):
    """Fused net2(relu(net1(x))) over one (tm, K) batch tile.

    The tile is processed in `chunk`-row sub-chunks so the hidden (chunk, 32)
    f32 activation stays in a handful of vregs.
    """
    tm = x_ref.shape[0]
    n_chunks = tm // chunk

    # Weights / biases: tiny, read once per grid step (VMEM-resident).
    w1 = w1_ref[...]
    b1 = b1_ref[...]
    w2 = w2_ref[...]
    b2 = b2_ref[...]

    def body(c, carry):
        r0 = pl.multiple_of(c * chunk, chunk)
        # In-kernel cast of x (VPU, free under a mem-bound regime).
        xb = x_ref[pl.ds(r0, chunk), :].astype(compute_dtype)
        # net1 on the MXU with f32 accumulation.
        h = jnp.dot(xb, w1, preferred_element_type=jnp.float32)
        # bias + ReLU in f32 on the VPU.
        h = jnp.maximum(h + b1, 0.0).astype(compute_dtype)
        # net2 on the MXU with f32 accumulation, then bias.
        o = jnp.dot(h, w2, preferred_element_type=jnp.float32) + b2
        o_ref[pl.ds(r0, chunk), :] = o.astype(o_ref.dtype)
        return carry

    lax.fori_loop(0, n_chunks, body, None, unroll=(n_chunks <= 8))


def toy_model_forward_pallas(x, w1, b1, w2, b2, *, block_rows=8192,
                             inner_chunk=1024, compute_dtype=jnp.bfloat16):
    """Fused Pallas forward. x: (B,10); w1: (10,32); b1: (32,); w2: (32,5); b2: (5,)."""
    B, K = x.shape
    H = w1.shape[1]
    N = w2.shape[1]
    out_dtype = x.dtype
    assert block_rows % inner_chunk == 0

    # Batch tile: big (default 8192 rows) so per-step traffic is MBs, shrunk to
    # a sublane-aligned size for small B. chunk always divides tm.
    if B >= block_rows:
        tm = block_rows
        chunk = inner_chunk
    else:
        chunk = min(inner_chunk, _round_up(B, 8))
        tm = _round_up(B, chunk)

    # Only the ~2 KB of weights/biases get cast in the wrapper; x stays in its
    # original dtype and is cast inside the kernel (saves a full HBM pass).
    w1c = w1.astype(compute_dtype)
    w2c = w2.astype(compute_dtype)
    b1_2d = b1.reshape(1, H).astype(jnp.float32)
    b2_2d = b2.reshape(1, N).astype(jnp.float32)

    grid = (pl.cdiv(B, tm),)

    # VMEM budget: x and out blocks pad their last dim to 128 lanes and are
    # double-buffered. Keep an explicit limit (v5e default is only 16 MiB);
    # cap at 64 MiB (v7x physical per-TC VMEM).
    lane_pad = 128
    x_buf = tm * lane_pad * jnp.dtype(x.dtype).itemsize
    o_buf = tm * lane_pad * jnp.dtype(out_dtype).itemsize
    vmem_need = 2 * (x_buf + o_buf) + (2 << 20)
    vmem_limit = int(min(max(vmem_need, 32 * 1024 * 1024), 64 * 1024 * 1024))

    # Memory-bound cost hint for XLA's scheduler.
    itemsize = jnp.dtype(x.dtype).itemsize
    cost = pl.CostEstimate(
        flops=2 * B * (K * H + H * N),
        transcendentals=0,
        bytes_accessed=B * K * itemsize + B * N * jnp.dtype(out_dtype).itemsize
        + (K * H + H * N) * 2 + (H + N) * 4,
    )

    kernel = functools.partial(toy_model_kernel, chunk=chunk,
                               compute_dtype=compute_dtype)

    return pl.pallas_call(
        kernel,
        out_shape=jax.ShapeDtypeStruct((B, N), out_dtype),
        grid=grid,
        in_specs=[
            # x: tiled over the batch axis, auto double-buffered.
            pl.BlockSpec((tm, K), lambda i: (i, 0)),
            # weights/biases: constant block index -> VMEM-resident, no re-DMA.
            pl.BlockSpec((K, H), lambda i: (0, 0)),
            pl.BlockSpec((1, H), lambda i: (0, 0)),
            pl.BlockSpec((H, N), lambda i: (0, 0)),
            pl.BlockSpec((1, N), lambda i: (0, 0)),
        ],
        # Output block covers the full N=5 last dim -> contiguous HBM writeback;
        # trailing partial batch tiles are boundary-masked by Pallas.
        out_specs=pl.BlockSpec((tm, N), lambda i: (i, 0)),
        compiler_params=pltpu.CompilerParams(
            # Batch axis is embarrassingly parallel -> megacore on v7x,
            # harmless no-op on v5e/v6e.
            dimension_semantics=("parallel",),
            vmem_limit_bytes=vmem_limit,
        ),
        cost_estimate=cost,
    )(x, w1c, b1_2d, w2c, b2_2d)


# Below this batch size, pallas_call launch/grid overhead dominates; XLA's
# fused dot is faster for tiny inputs.
_PALLAS_MIN_BATCH = 4096


def toy_model_forward(x, w1, b1, w2, b2, **kwargs):
    """Dispatcher: plain jnp for tiny batches, Pallas kernel for large ones."""
    if x.shape[0] < _PALLAS_MIN_BATCH:
        return (jnp.maximum(x @ w1 + b1, 0.0) @ w2 + b2).astype(x.dtype)
    return toy_model_forward_pallas(x, w1, b1, w2, b2, **kwargs)


def init_params(key):
    """Deterministic init mirroring nn.Linear shapes.

    PyTorch stores Linear weight as (out, in); we store the transpose (in, out)
    so the kernel does x @ W directly.
    """
    k1, k2, k3, k4 = jax.random.split(key, 4)
    in1, out1 = 10, 32
    in2, out2 = 32, 5
    bound1 = 1.0 / jnp.sqrt(in1)
    bound2 = 1.0 / jnp.sqrt(in2)
    w1 = jax.random.uniform(k1, (in1, out1), jnp.float32, -bound1, bound1)
    b1 = jax.random.uniform(k2, (out1,), jnp.float32, -bound1, bound1)
    w2 = jax.random.uniform(k3, (in2, out2), jnp.float32, -bound2, bound2)
    b2 = jax.random.uniform(k4, (out2,), jnp.float32, -bound2, bound2)
    return w1, b1, w2, b2


if __name__ == "__main__":
    key = jax.random.PRNGKey(0)
    kx, kx2, kp = jax.random.split(key, 3)

    w1, b1, w2, b2 = init_params(kp)

    # 1) Small batch, f32 compute inside the kernel -> tight check vs reference.
    batch = 16
    x = jax.random.normal(kx, (batch, 10), jnp.float32)
    ref = jnp.maximum(x @ w1 + b1, 0.0) @ w2 + b2
    out_f32 = jax.block_until_ready(
        toy_model_forward_pallas(x, w1, b1, w2, b2, compute_dtype=jnp.float32))
    assert out_f32.shape == (batch, 5), out_f32.shape
    assert jnp.allclose(out_f32, ref, atol=1e-5, rtol=1e-5), "f32 kernel mismatch"

    # 2) Larger batch with a partial trailing tile, default bf16 compute ->
    #    exercises the multi-step grid, inner chunk loop and boundary masking.
    batch2 = 20000
    x2 = jax.random.normal(kx2, (batch2, 10), jnp.float32)
    ref2 = jnp.maximum(x2 @ w1 + b1, 0.0) @ w2 + b2
    out_bf16 = jax.block_until_ready(
        toy_model_forward_pallas(x2, w1, b1, w2, b2, block_rows=8192))
    assert out_bf16.shape == (batch2, 5), out_bf16.shape
    assert out_bf16.dtype == jnp.float32
    assert jnp.allclose(out_bf16, ref2, atol=1e-1, rtol=1e-1), "bf16 kernel mismatch"

    # 3) Dispatcher path (tiny batch -> plain jnp).
    out_disp = jax.block_until_ready(toy_model_forward(x, w1, b1, w2, b2))
    assert out_disp.shape == (batch, 5)
    assert jnp.allclose(out_disp, ref, atol=1e-5, rtol=1e-5)

    print("KERNEL_OK")
</pallas_src>

<mosaic_0001>
module attributes {stable_mosaic.version = 11 : i64} {
  func.func @toy_model_kernel(%arg0: i32, %arg1: memref<16x10xf32, #tpu.memory_space<vmem>>, %arg2: memref<10x32xf32, #tpu.memory_space<vmem>>, %arg3: memref<1x32xf32, #tpu.memory_space<vmem>>, %arg4: memref<32x5xf32, #tpu.memory_space<vmem>>, %arg5: memref<1x5xf32, #tpu.memory_space<vmem>>, %arg6: memref<16x5xf32, #tpu.memory_space<vmem>>) attributes {dimension_semantics = [#tpu.dimension_semantics<parallel>], iteration_bounds = array<i64: 1>, scalar_prefetch = 0 : i64, scratch_operands = 0 : i64, tpu.core_type = #tpu.core_type<tc>, window_params = [{transform_indices = @transform_0, window_bounds = array<i64: 16, 10>}, {pipeline_mode = #tpu.pipeline_mode<synchronous>, transform_indices = @transform_1, window_bounds = array<i64: 10, 32>}, {pipeline_mode = #tpu.pipeline_mode<synchronous>, transform_indices = @transform_2, window_bounds = array<i64: 1, 32>}, {pipeline_mode = #tpu.pipeline_mode<synchronous>, transform_indices = @transform_3, window_bounds = array<i64: 32, 5>}, {pipeline_mode = #tpu.pipeline_mode<synchronous>, transform_indices = @transform_4, window_bounds = array<i64: 1, 5>}, {transform_indices = @transform_5, window_bounds = array<i64: 16, 5>}]} {
    %c0 = arith.constant 0 : index
    %c0_0 = arith.constant 0 : index
    %0 = vector.load %arg2[%c0, %c0_0] : memref<10x32xf32, #tpu.memory_space<vmem>>, vector<10x32xf32>
    %c0_1 = arith.constant 0 : index
    %c0_2 = arith.constant 0 : index
    %1 = vector.load %arg3[%c0_1, %c0_2] : memref<1x32xf32, #tpu.memory_space<vmem>>, vector<1x32xf32>
    %c0_3 = arith.constant 0 : index
    %c0_4 = arith.constant 0 : index
    %2 = vector.load %arg4[%c0_3, %c0_4] : memref<32x5xf32, #tpu.memory_space<vmem>>, vector<32x5xf32>
    %c0_5 = arith.constant 0 : index
    %c0_6 = arith.constant 0 : index
    %3 = vector.load %arg5[%c0_5, %c0_6] : memref<1x5xf32, #tpu.memory_space<vmem>>, vector<1x5xf32>
    %c0_i32 = arith.constant 0 : i32
    %c16_i32 = arith.constant 16 : i32
    %4 = arith.muli %c0_i32, %c16_i32 : i32
    %5 = tpu.assume_multiple %4, 16 : i32
    %6 = arith.index_cast %5 : i32 to index
    %c0_7 = arith.constant 0 : index
    %7 = vector.load %arg1[%6, %c0_7] : memref<16x10xf32, #tpu.memory_space<vmem>>, vector<16x10xf32>
    %cst = arith.constant dense<0.000000e+00> : vector<16x32xf32>
    %8 = tpu.matmul %7, %0, %cst {dimension_numbers = #tpu.dot_dimension_numbers<[1], [0], [0], [1], [0, 0, 1, 1], [], []>} : vector<16x10xf32>, vector<10x32xf32>, vector<16x32xf32> -> vector<16x32xf32>
    %9 = vector.broadcast %1 : vector<1x32xf32> to vector<16x32xf32>
    %10 = arith.addf %8, %9 : vector<16x32xf32>
    %cst_8 = arith.constant 0.000000e+00 : f32
    %11 = vector.broadcast %cst_8 : f32 to vector<16x32xf32>
    %12 = arith.maximumf %10, %11 : vector<16x32xf32>
    %cst_9 = arith.constant dense<0.000000e+00> : vector<16x5xf32>
    %13 = tpu.matmul %12, %2, %cst_9 {dimension_numbers = #tpu.dot_dimension_numbers<[1], [0], [0], [1], [0, 0, 1, 1], [], []>} : vector<16x32xf32>, vector<32x5xf32>, vector<16x5xf32> -> vector<16x5xf32>
    %14 = vector.broadcast %3 : vector<1x5xf32> to vector<16x5xf32>
    %15 = arith.addf %13, %14 : vector<16x5xf32>
    %16 = arith.index_cast %5 : i32 to index
    %c0_10 = arith.constant 0 : index
    %17 = vector.load %arg6[%16, %c0_10] : memref<16x5xf32, #tpu.memory_space<vmem>>, vector<16x5xf32>
    tpu.vector_store %arg6[%16, %c0_10], %15 {strides = array<i32>} : memref<16x5xf32, #tpu.memory_space<vmem>>, vector<16x5xf32>,
    %c1_i32 = arith.constant 1 : i32
    return
  }
  func.func @transform_0(%arg0: i32) -> (i32, i32) {
    %c0_i32 = arith.constant 0 : i32
    %c0_i32_0 = arith.constant 0 : i32
    return %arg0, %c0_i32 : i32, i32
  }
  func.func @transform_1(%arg0: i32) -> (i32, i32) {
    %c0_i32 = arith.constant 0 : i32
    %c0_i32_0 = arith.constant 0 : i32
    %c0_i32_1 = arith.constant 0 : i32
    return %c0_i32, %c0_i32_0 : i32, i32
  }
  func.func @transform_2(%arg0: i32) -> (i32, i32) {
    %c0_i32 = arith.constant 0 : i32
    %c0_i32_0 = arith.constant 0 : i32
    %c0_i32_1 = arith.constant 0 : i32
    return %c0_i32, %c0_i32_0 : i32, i32
  }
  func.func @transform_3(%arg0: i32) -> (i32, i32) {
    %c0_i32 = arith.constant 0 : i32
    %c0_i32_0 = arith.constant 0 : i32
    %c0_i32_1 = arith.constant 0 : i32
    return %c0_i32, %c0_i32_0 : i32, i32
  }
  func.func @transform_4(%arg0: i32) -> (i32, i32) {
    %c0_i32 = arith.constant 0 : i32
    %c0_i32_0 = arith.constant 0 : i32
    %c0_i32_1 = arith.constant 0 : i32
    return %c0_i32, %c0_i32_0 : i32, i32
  }
  func.func @transform_5(%arg0: i32) -> (i32, i32) {
    %c0_i32 = arith.constant 0 : i32
    %c0_i32_0 = arith.constant 0 : i32
    return %arg0, %c0_i32 : i32, i32
  }
}

</mosaic_0001>

<bundles_post_ra>
// kernel: tpu_custom_call.1
= control target key start
LH: loop header
LB: loop body
LE: loop exit
PB: predicated region body
PF: predicated region fallthrough
CT: control target
= control target key end

     0   :  { %vm40_vm0 = vcmask 1041408   ;;  %vm33_vm1 = vcmask 80896   ;;  %vm72_vm2 = vcmask 261120   ;;  %vm102_vm3 = vcmask 39936   ;;  %s188_s1 = inlined_call_operand.vmem [shape: f32[10,32], index: 1, kind: input, shape index: {}]   ;;  %s189_s0 = inlined_call_operand.vmem [shape: f32[16,10], index: 0, kind: input, shape index: {}]   ;;  %s190_s3 = inlined_call_operand.vmem [shape: f32[32,5], index: 3, kind: input, shape index: {}]   ;;  %s191_s2 = inlined_call_operand.vmem [shape: f32[1,32], index: 2, kind: input, shape index: {}]   ;;  %s192_s4 = inlined_call_operand.vmem [shape: f32[1,5], index: 4, kind: input, shape index: {}]   ;;  %s193_s5 = inlined_call_operand.vmem [shape: f32[16,5], index: 5, kind: output, shape index: {}]  }
   0x1   :  { %v21_v0 = vld [vmem:[%s188_s1 + $0x8] sm:$0x3]  ;;  %v20_v1 = vld [vmem:[%s188_s1] sm:$0xff]  ;;  %v26_v4 = vld [vmem:[%s190_s3 + $0x18] sm:$0xff] }
   0x2   :  { %v29_v2 = vld [vmem:[%s189_s0 + $0x8] sm:$0xff]  ;;  %114 = vmatpush.msk.msra.mxu3 %vm40_vm0, %v21_v0  ;;  %109 = vmatpush.msk.msra.mxu0 %vm40_vm0, %v21_v0  ;;  %v28_v3 = vld [vmem:[%s189_s0] sm:$0xff]  ;;  %v25_v5 = vld [vmem:[%s190_s3 + $0x10] sm:$0xff] }
   0x3   :  { %116 = vmatpush.msra.mxu2 %v26_v4  ;;  %91 = vmatpush.msra.mxu1 %v26_v4  ;;  %v24_v6 = vld [vmem:[%s190_s3 + $0x8] sm:$0xff]  ;;  %v23_v7 = vld [vmem:[%s190_s3] sm:$0xff] }
   0x4   :  { %115 = vmatpush.msra.mxu3 %v20_v1  ;;  %59 = vmatpush.msra.mxu0 %v20_v1  ;;  %v120_v8 = vld [vmem:[%s191_s2] ss:$0 sm:$0xff] }
   0x5   :  { %111 = vmatmul.msk.f32.vlgmr.msra.gmra.mxu3 %vm33_vm1, %v29_v2  ;;  %110 = vmatmul.msk.f32.vlgmr.msra.gmra.mxu0 %vm33_vm1, %v28_v3  ;;  %v121_v15 = vld [vmem:[%s192_s4] ss:$0 sm:$0xff] }
   0x6   :  { %117 = vmatpush.msra.mxu2 %v25_v5  ;;  %92 = vmatpush.msra.mxu1 %v25_v5 }
   0x8   :  { %118 = vmatpush.msra.mxu2 %v24_v6  ;;  %93 = vmatpush.msra.mxu1 %v24_v6 }
   0xa   :  { %119 = vmatpush.msra.mxu2 %v23_v7  ;;  %94 = vmatpush.msra.mxu1 %v23_v7 }
  0x82   :  { %v61_v9 = vpop.f32.mrf.mxu0 }
  0x83   :  { %v62_v10 = vadd.f32 %v120_v8, %v61_v9 }
  0x85   :  { %v67_v11 = vmax.f32 %v62_v10, 0.0 }
  0x87   :  { %112 = vmatmul.msk.f32.vlgmr.msra.gmra.mxu1 %vm72_vm2, %v67_v11 }
  0x88   :  { %v64_v12 = vpop.f32.mrf.mxu3 }
  0x89   :  { %v65_v13 = vadd.f32 %v120_v8, %v64_v12 }
  0x8b   :  { %v68_v14 = vmax.f32 %v65_v13, 0.0 }
  0x8d   :  { %113 = vmatmul.msk.f32.vlgmr.msra.gmra.mxu2 %vm72_vm2, %v68_v14 }
 0x104   :  { %v96_v16 = vpop.f32.mrf.mxu1 }
 0x105   :  { %v97_v17 = vadd.f32 %v121_v15, %v96_v16 }
 0x107   :  { %103 = vst.msk [vmem:[%s193_s5] sm:$0xff] %vm102_vm3, %v97_v17 }
 0x110   :  { %v99_v18 = vpop.f32.mrf.mxu2 }
 0x111   :  { %v100_v19 = vadd.f32 %v121_v15, %v99_v18 }
 0x113   :  { %104 = vst.msk [vmem:[%s193_s5 + $0x8] sm:$0xff] %vm102_vm3, %v100_v19 }

</bundles_post_ra>
